<compile_context>
chip_gen: v7x
topology: tpu7x:2x2x1
jax: 0.10.0
libtpu: 0.0.40
codegen_flags: <defaults>
</compile_context>

<pallas_src>
import jax
import jax.numpy as jnp
from jax.experimental import pallas as pl
from jax.experimental.pallas import tpu as pltpu


def _classifier_kernel(x_ref, w1t_ref, b1_ref, wcn_ref, out_ref):
    # x_ref  : (TM, Dp)  row tile of inputs
    # w1t_ref: (Dp, Dp)  Linear weight, already transposed to (in, out)
    # b1_ref : (1,  Dp)  Linear bias
    # wcn_ref: (Dp, Cp)  column-L2-normalized classifier weight (pre-normalized)
    # out_ref: (TM, Cp)
    x = x_ref[...]

    # nn.Linear: x @ W1.T + b1   (MXU, f32 accumulate)
    h = jnp.dot(x, w1t_ref[...], preferred_element_type=jnp.float32) + b1_ref[...]

    # F.normalize(h, dim=1): h / max(||h||_2, 1e-12)
    # rsqrt(max(ssq, eps^2)) == 1 / max(||h||, eps); rsqrt lowers to the EUP.
    ssq = jnp.sum(h * h, axis=-1, keepdims=True)
    inv_norm = jax.lax.rsqrt(jnp.maximum(ssq, jnp.float32(1e-24)))
    h_n = h * inv_norm

    # NormedLinear matmul (W2 columns were normalized in the wrapper)
    out_ref[...] = jnp.dot(h_n, wcn_ref[...], preferred_element_type=jnp.float32)


def classifier_forward(x, params, *, tm=128, lane=128):
    """x: (N, hid_dim) float32. params: {'w1': (D,D), 'b1': (D,), 'w2': (D,C)}."""
    N, D = x.shape
    w1, b1, w2 = params["w1"], params["b1"], params["w2"]
    C = w2.shape[1]

    # ---- glue (plain JAX, data-independent): hoisted W2 column normalization ----
    w2_norm = jnp.sqrt(jnp.sum(w2 * w2, axis=0, keepdims=True))
    w2n = w2 / jnp.maximum(w2_norm, 1e-12)

    # ---- pad to lane-dense / tile-aligned shapes (zeros keep math exact) ----
    Dp = max(lane, pl.cdiv(D, lane) * lane)
    Cp = max(lane, pl.cdiv(C, lane) * lane)
    Np = pl.cdiv(N, tm) * tm

    x_p = jnp.zeros((Np, Dp), jnp.float32).at[:N, :D].set(x)
    w1t_p = jnp.zeros((Dp, Dp), jnp.float32).at[:D, :D].set(w1.T)
    b1_p = jnp.zeros((1, Dp), jnp.float32).at[0, :D].set(b1)
    w2n_p = jnp.zeros((Dp, Cp), jnp.float32).at[:D, :C].set(w2n)

    grid = (Np // tm,)
    out_p = pl.pallas_call(
        _classifier_kernel,
        out_shape=jax.ShapeDtypeStruct((Np, Cp), jnp.float32),
        grid=grid,
        in_specs=[
            pl.BlockSpec((tm, Dp), lambda i: (i, 0)),   # x row tile (pipelined)
            pl.BlockSpec((Dp, Dp), lambda i: (0, 0)),   # W1.T (resident)
            pl.BlockSpec((1, Dp), lambda i: (0, 0)),    # b1   (resident)
            pl.BlockSpec((Dp, Cp), lambda i: (0, 0)),   # normalized W2 (resident)
        ],
        out_specs=pl.BlockSpec((tm, Cp), lambda i: (i, 0)),
        compiler_params=pltpu.CompilerParams(
            dimension_semantics=("parallel",)),
    )(x_p, w1t_p, b1_p, w2n_p)

    return out_p[:N, :C]


def init_params(key, hid_dim, num_cls):
    k1, k2, k3 = jax.random.split(key, 3)
    bound = 1.0 / float(hid_dim) ** 0.5
    # nn.Linear default init (uniform +- 1/sqrt(fan_in)); weight stored (out,in).
    w1 = jax.random.uniform(k1, (hid_dim, hid_dim), jnp.float32, -bound, bound)
    b1 = jax.random.uniform(k2, (hid_dim,), jnp.float32, -bound, bound)
    # NormedLinear init: uniform(-1,1).renorm_(2,1,1e-5).mul_(1e5) only rescales
    # columns; the forward normalizes columns anyway, so direction is all that
    # matters and plain uniform(-1,1) is equivalent for testing.
    w2 = jax.random.uniform(k3, (hid_dim, num_cls), jnp.float32, -1.0, 1.0)
    return {"w1": w1, "b1": b1, "w2": w2}


def reference_forward(x, params):
    """Pure-JAX reference mirroring the PyTorch module."""
    h = x @ params["w1"].T + params["b1"]
    h_n = h / jnp.maximum(jnp.linalg.norm(h, axis=1, keepdims=True), 1e-12)
    w2 = params["w2"]
    w_n = w2 / jnp.maximum(jnp.linalg.norm(w2, axis=0, keepdims=True), 1e-12)
    return h_n @ w_n


if __name__ == "__main__":
    N, HID, NCLS = 256, 32, 8   # batch=256 rows -> grid of 2 row tiles
    key = jax.random.PRNGKey(0)
    kx, kp = jax.random.split(key)

    x = jax.random.normal(kx, (N, HID), jnp.float32)
    params = init_params(kp, HID, NCLS)

    out = classifier_forward(x, params)
    out = jax.block_until_ready(out)

    ref = reference_forward(x, params)
    assert out.shape == (N, NCLS)
    assert jnp.allclose(out, ref, atol=1e-5, rtol=1e-4), float(
        jnp.max(jnp.abs(out - ref)))

    print("KERNEL_OK")
</pallas_src>

<mosaic_0001>
module attributes {stable_mosaic.version = 11 : i64} {
  func.func @_classifier_kernel(%arg0: i32, %arg1: memref<128x128xf32, #tpu.memory_space<vmem>>, %arg2: memref<128x128xf32, #tpu.memory_space<vmem>>, %arg3: memref<1x128xf32, #tpu.memory_space<vmem>>, %arg4: memref<128x128xf32, #tpu.memory_space<vmem>>, %arg5: memref<128x128xf32, #tpu.memory_space<vmem>>) attributes {dimension_semantics = [#tpu.dimension_semantics<parallel>], iteration_bounds = array<i64: 2>, scalar_prefetch = 0 : i64, scratch_operands = 0 : i64, tpu.core_type = #tpu.core_type<tc>, window_params = [{transform_indices = @transform_0, window_bounds = array<i64: 128, 128>}, {pipeline_mode = #tpu.pipeline_mode<synchronous>, transform_indices = @transform_1, window_bounds = array<i64: 128, 128>}, {pipeline_mode = #tpu.pipeline_mode<synchronous>, transform_indices = @transform_2, window_bounds = array<i64: 1, 128>}, {pipeline_mode = #tpu.pipeline_mode<synchronous>, transform_indices = @transform_3, window_bounds = array<i64: 128, 128>}, {transform_indices = @transform_4, window_bounds = array<i64: 128, 128>}]} {
    %c0 = arith.constant 0 : index
    %c0_0 = arith.constant 0 : index
    %0 = vector.load %arg1[%c0, %c0_0] : memref<128x128xf32, #tpu.memory_space<vmem>>, vector<128x128xf32>
    %c0_1 = arith.constant 0 : index
    %c0_2 = arith.constant 0 : index
    %1 = vector.load %arg2[%c0_1, %c0_2] : memref<128x128xf32, #tpu.memory_space<vmem>>, vector<128x128xf32>
    %cst = arith.constant dense<0.000000e+00> : vector<128x128xf32>
    %2 = tpu.matmul %0, %1, %cst {dimension_numbers = #tpu.dot_dimension_numbers<[1], [0], [0], [1], [0, 0, 1, 1], [], []>} : vector<128x128xf32>, vector<128x128xf32>, vector<128x128xf32> -> vector<128x128xf32>
    %c0_3 = arith.constant 0 : index
    %c0_4 = arith.constant 0 : index
    %3 = vector.load %arg3[%c0_3, %c0_4] : memref<1x128xf32, #tpu.memory_space<vmem>>, vector<1x128xf32>
    %4 = vector.broadcast %3 : vector<1x128xf32> to vector<128x128xf32>
    %5 = arith.addf %2, %4 : vector<128x128xf32>
    %6 = arith.mulf %5, %5 : vector<128x128xf32>
    %cst_5 = arith.constant dense<0.000000e+00> : vector<128xf32>
    %7 = vector.multi_reduction <add>, %6, %cst_5 [1] : vector<128x128xf32> to vector<128xf32>
    %8 = vector.shape_cast %7 : vector<128xf32> to vector<128x1xf32>
    %cst_6 = arith.constant 1.000000e-24 : f32
    %9 = vector.broadcast %cst_6 : f32 to vector<128x1xf32>
    %10 = arith.maximumf %8, %9 : vector<128x1xf32>
    %11 = math.rsqrt %10 : vector<128x1xf32>
    %12 = vector.broadcast %11 : vector<128x1xf32> to vector<128x128xf32>
    %13 = arith.mulf %5, %12 : vector<128x128xf32>
    %c0_7 = arith.constant 0 : index
    %c0_8 = arith.constant 0 : index
    %14 = vector.load %arg4[%c0_7, %c0_8] : memref<128x128xf32, #tpu.memory_space<vmem>>, vector<128x128xf32>
    %cst_9 = arith.constant dense<0.000000e+00> : vector<128x128xf32>
    %15 = tpu.matmul %13, %14, %cst_9 {dimension_numbers = #tpu.dot_dimension_numbers<[1], [0], [0], [1], [0, 0, 1, 1], [], []>} : vector<128x128xf32>, vector<128x128xf32>, vector<128x128xf32> -> vector<128x128xf32>
    %c0_10 = arith.constant 0 : index
    %c0_11 = arith.constant 0 : index
    %16 = vector.load %arg5[%c0_10, %c0_11] : memref<128x128xf32, #tpu.memory_space<vmem>>, vector<128x128xf32>
    tpu.vector_store %arg5[%c0_10, %c0_11], %15 {strides = array<i32>} : memref<128x128xf32, #tpu.memory_space<vmem>>, vector<128x128xf32>,
    return
  }
  func.func @transform_0(%arg0: i32) -> (i32, i32) {
    %c0_i32 = arith.constant 0 : i32
    %c0_i32_0 = arith.constant 0 : i32
    return %arg0, %c0_i32 : i32, i32
  }
  func.func @transform_1(%arg0: i32) -> (i32, i32) {
    %c0_i32 = arith.constant 0 : i32
    %c0_i32_0 = arith.constant 0 : i32
    %c0_i32_1 = arith.constant 0 : i32
    return %c0_i32, %c0_i32_0 : i32, i32
  }
  func.func @transform_2(%arg0: i32) -> (i32, i32) {
    %c0_i32 = arith.constant 0 : i32
    %c0_i32_0 = arith.constant 0 : i32
    %c0_i32_1 = arith.constant 0 : i32
    return %c0_i32, %c0_i32_0 : i32, i32
  }
  func.func @transform_3(%arg0: i32) -> (i32, i32) {
    %c0_i32 = arith.constant 0 : i32
    %c0_i32_0 = arith.constant 0 : i32
    %c0_i32_1 = arith.constant 0 : i32
    return %c0_i32, %c0_i32_0 : i32, i32
  }
  func.func @transform_4(%arg0: i32) -> (i32, i32) {
    %c0_i32 = arith.constant 0 : i32
    %c0_i32_0 = arith.constant 0 : i32
    return %arg0, %c0_i32 : i32, i32
  }
}

</mosaic_0001>

<bundles_post_ra>
// kernel: tpu_custom_call.1
= control target key start
LH: loop header
LB: loop body
LE: loop exit
PB: predicated region body
PF: predicated region fallthrough
CT: control target
= control target key end

     0   :  { %9 = vsyncpa [#allocation3], 0  ;;  %s1750_s0 = inlined_call_operand.hbm [shape: f32[256,128], index: 0, kind: input, shape index: {}]   ;;  %s1751_s1 = inlined_call_operand.hbm [shape: f32[128,128], index: 1, kind: input, shape index: {}]   ;;  %s1752_s2 = inlined_call_operand.vmem [shape: f32[1,128], index: 2, kind: input, shape index: {}]   ;;  %s1753_s3 = inlined_call_operand.hbm [shape: f32[128,128], index: 3, kind: input, shape index: {}]   ;;  %s1754_s4 = inlined_call_operand.hbm [shape: f32[256,128], index: 4, kind: output, shape index: {}]  }
   0x1   :  { %11 = vsyncpa [#allocation3 + $0x1], 0 }
   0x2   :  { %12 = vsyncpa [#allocation6], 0 }
   0x3   :  { %13 = vsyncpa [#allocation4], 0 }
   0x4   :  { %15 = vsyncpa [#allocation4 + $0x1], 0  ;;  %s1365_s15 = smov 0   ;;  %s1367_s16 = smov 0  }
   0x5   :  { %s1369_s17 = smov 0   ;;  %s1371_s18 = smov 0  }
   0x6 LB: > { %s1386_s19 = sadd.s32 4294967295, %s1330_s18   ;;  %s810_s20 = sadd.s32 4294967294, %s1330_s18   ;;  %s1330_s18 = sphi %s1371_s18, %s1774_s18   ;;  %s1326_s17 = sphi %s1369_s17, %s1773_s17   ;;  %s1322_s16 = sphi %s1367_s16, %s1772_s16   ;;  %s1318_s15 = sphi %s1365_s15, %s1771_s15  }
   0x7   : > { %p41_p0 = scmp.ne.s32.totalorder %s1322_s16, %s1318_s15  ;;  %p1755_p1 = scmp.eq.s32.totalorder %s1386_s19, 0 }
   0x8   : > { %p134_p3 = scmp.eq.s32.totalorder %s810_s20, 1  ;;  %p811_p5 = scmp.ge.s32.totalorder %s1330_s18, 1 }
   0x9   : > { %p1395_p4 = por %p1755_p1, %p41_p0  ;;  %p141_p7 = scmp.lt.s32.totalorder %s1330_s18, 3 }
   0xa   : > { %p1400_p6 = por %p134_p3, %p41_p0  ;;  %s1332_s24 = smov [#allocation5]  }
   0xb   : > { %s1758_s21 = scalar_select %p1395_p4, 1, 0 }
   0xc   : > { %s1759_s22 = scalar_select %p1400_p6, 1, 0 }
   0xd   : > { %p1405_p8 = pnand %p811_p5, %p141_p7  ;;  %s153_s25 = sshll.u32 %s1332_s24, 4  ;;  %s1409_s25 = int_to_ptr.vmem [resolvable:$true] %s153_s25 }
   0xe   : > { %s1333_s27 = smov [#allocation7]   ;;  %s1174_s5 = scalar_lea.hbm %s1751_s1, 2048 }
   0xf   : > { %p1083_p9 = pneg %p1405_p8  ;;  %s169_s28 = sshll.u32 %s1333_s27, 4  ;;  %s1420_s28 = int_to_ptr.vmem [resolvable:$true] %s169_s28 }
  0x10   : > { %p1175_p12 = scmp.ne.s32.totalorder %s1751_s1, %s1174_s5  ;;  %p1181_p5 = scmp.lt.u32.totalorder %s1174_s5, %s1751_s1 }
  0x11   : > { %p1416_p11 = pnand %p1083_p9, %p1755_p1 }
  0x13   : > { %p1176_p13 = pneg %p1416_p11 }
  0x15   : > { %p1177_p0 = pnand %p1176_p13, %p1175_p12 }
  0x17   : > { %p1178_p3 = pneg %p1177_p0 }
  0x19   : > { %p1183_p7 = pnand %p1181_p5, %p1178_p3 }
  0x1b   : > { %1186 = shalt.err (!%p1183_p7)
}
  0x1c   : > { %s1187_s10 = scalar_lea.vmem %s1409_s25, 2048  ;;  %p1195_p2 = scmp.lt.s32.totalorder %s1409_s25, %s1409_s25 }
  0x1d   : > { %p1188_p9 = scmp.ne.s32.totalorder %s1409_s25, %s1187_s10  ;;  %p1196_p12 = scmp.lt.s32.totalorder %s1187_s10, %s1187_s10 }
  0x1f   : > { %p1190_p10 = pnand %p1188_p9, %p1176_p13  ;;  %p1197_p0 = por %p1196_p12, %p1195_p2 }
  0x21   : > { %p1191_p1 = pneg %p1190_p10 }
  0x23   : > { %p1198_p6 = pnand %p1197_p0, %p1191_p1 }
  0x25   : > { %1201 = shalt.err (!%p1198_p6)
}
  0x26   : > { %s1334_s11 = smov 128   ;;  %s1335_s12 = smov 8  }
  0x27   : > { %1086 = dma.hbm_to_vmem [thread:$0]  (!%p1416_p11), %s1751_s1, 2048, %s1409_s25, [#allocation6], %s1334_s11, %s1334_s11, %s1335_s12  }
  0x28   : > { %s1202_s27 = scalar_lea.hbm %s1753_s3, 2048 }
  0x29   : > { %p1203_p1 = scmp.ne.s32.totalorder %s1753_s3, %s1202_s27  ;;  %p1209_p10 = scmp.lt.u32.totalorder %s1202_s27, %s1753_s3 }
  0x2b   : > { %p1205_p2 = pnand %p1203_p1, %p1176_p13 }
  0x2d   : > { %p1206_p6 = pneg %p1205_p2 }
  0x2f   : > { %p1211_p3 = pnand %p1209_p10, %p1206_p6 }
  0x31   : > { %1214 = shalt.err (!%p1211_p3)
}
  0x32   : > { %s1215_s25 = scalar_lea.vmem %s1420_s28, 2048  ;;  %p1223_p12 = scmp.lt.s32.totalorder %s1420_s28, %s1420_s28 }
  0x33   : > { %p1216_p5 = scmp.ne.s32.totalorder %s1420_s28, %s1215_s25  ;;  %p1224_p0 = scmp.lt.s32.totalorder %s1215_s25, %s1215_s25 }
  0x35   : > { %p1218_p7 = pnand %p1216_p5, %p1176_p13  ;;  %p1225_p1 = por %p1224_p0, %p1223_p12 }
  0x37   : > { %p1219_p9 = pneg %p1218_p7 }
  0x39   : > { %p1226_p2 = pnand %p1225_p1, %p1219_p9 }
  0x3b   : > { %1229 = shalt.err (!%p1226_p2)
}
  0x3c   : > { %1089 = dma.hbm_to_vmem [thread:$0]  (!%p1416_p11), %s1753_s3, 2048, %s1420_s28, [#allocation6], %s1334_s11, %s1334_s11, %s1335_s12  }
  0x3d   : > { %s1481_s26 = sadd.s32 1, %s1330_s18   ;;  %s28_s9 = sadd.s32 1, %s1326_s17 }
  0x3e   : > { %s25_s10 = ssub.s32 %s1330_s18, %s1481_s26  ;;  %p35_p13 = scmp.ne.s32.totalorder %s1326_s17, %s1322_s16 }
  0x3f   : > { %p26_p6 = scmp.eq.s32.totalorder %s25_s10, 0  ;;  %p36_p10 = scmp.eq.s32.totalorder %s1330_s18, 0 }
  0x40   : > { %p1762_p3 = scmp.eq.s32.totalorder %s1386_s19, 1  ;;  %p1100_p7 = scmp.lt.s32.totalorder %s1330_s18, 2 }
  0x41   : > { %s1497_s14 = scalar_select %p26_p6, %s1326_s17, %s28_s9  }
  0x42   : > { %p1491_p5 = por %p1762_p3, %p35_p13  ;;  %p37_p9 = por %p36_p10, %p35_p13 }
  0x43   : > { %s183_s20 = sand.u32 1, %s1326_s17   ;;  %s829_s28 = sshll.u32 %s1330_s18, 11 }
  0x44   : > { %s1763_s13 = scalar_select %p1491_p5, 1, 0 }
  0x45   : > { %s815_s24 = sshll.u32 %s183_s20, 7  ;;  %s1504_s30 = scalar_lea.hbm %s1750_s0, %s829_s28 }
  0x46   : > { %s187_s5 = scalar_lea.vmem [#allocation2], %s815_s24  ;;  %p1508_p11 = pnand %p1100_p7, %p37_p9 }
  0x47   : > { %s194_s6 = sshll.u32 %s187_s5, 4  ;;  %s1512_s7 = scalar_lea.sflag [#allocation3], %s183_s20  ;;  %s1506_s6 = int_to_ptr.vmem [resolvable:$true] %s194_s6 }
  0x48   : > { %s1230_s8 = scalar_lea.hbm %s1504_s30, 2048  ;;  %p1232_p0 = pneg %p1508_p11 }
  0x49   : > { %p1231_p12 = scmp.ne.s32.totalorder %s1504_s30, %s1230_s8  ;;  %s1235_s24 = scalar_lea.hbm %s1750_s0, 4096 }
  0x4a   : > { %p1236_p13 = scmp.lt.u32.totalorder %s1504_s30, %s1750_s0  ;;  %p1237_p6 = scmp.lt.u32.totalorder %s1235_s24, %s1230_s8 }
  0x4b   : > { %p1233_p1 = pnand %p1232_p0, %p1231_p12  ;;  %p1239_p3 = scmp.lt.u32.totalorder %s1230_s8, %s1504_s30 }
  0x4c   : > { %p1238_p10 = por %p1237_p6, %p1236_p13 }
  0x4d   : > { %p1234_p2 = pneg %p1233_p1 }
  0x4e   : > { %p1240_p7 = por %p1239_p3, %p1238_p10 }
  0x50   : > { %p1241_p9 = pnand %p1240_p7, %p1234_p2 }
  0x52   : > { %1244 = shalt.err (!%p1241_p9)
}
  0x53   : > { %s1245_s20 = scalar_lea.vmem %s1506_s6, 2048  ;;  %s1336_s29 = smov [#allocation2]  }
  0x54   : > { %p1246_p12 = scmp.ne.s32.totalorder %s1506_s6, %s1245_s20  ;;  %s1250_s5 = sshll.u32 %s1336_s29, 4  ;;  %s1251_s5 = int_to_ptr.vmem [resolvable:$false] %s1250_s5 }
  0x55   : > { %s1252_s9 = scalar_lea.vmem %s1251_s5, 4096  ;;  %p1253_p4 = scmp.lt.s32.totalorder %s1506_s6, %s1251_s5 }
  0x56   : > { %p1248_p1 = pnand %p1246_p12, %p1232_p0  ;;  %p1254_p13 = scmp.lt.s32.totalorder %s1252_s9, %s1245_s20 }
  0x58   : > { %p1249_p5 = pneg %p1248_p1  ;;  %p1255_p6 = por %p1254_p13, %p1253_p4 }
  0x5a   : > { %p1256_p10 = pnand %p1255_p6, %p1249_p5 }
  0x5c   : > { %1259 = shalt.err (!%p1256_p10)
}
  0x5d   : > { %1093 = dma.hbm_to_vmem [thread:$0]  (!%p1508_p11), %s1504_s30, 2048, %s1506_s6, %s1512_s7, %s1334_s11, %s1334_s11, %s1335_s12  }
  0x5e   : > { %206 = sbr.rel (%p1405_p8) target bundleno = 775 (0x307), region = 36  ;;  %s1546_s8 = sand.u32 (!%p1405_p8), 1, %s1322_s16  }
  0x5f   : > { %s819_s10 = sshll.u32 (!%p1405_p8), %s1546_s8, 7  ;;  %s209_s24 = scalar_lea.sflag (!%p1405_p8), [#allocation3], %s1546_s8 }
  0x60   : > { %s1552_s25 = scalar_lea.vmem (!%p1405_p8), [#allocation2], %s819_s10  ;;  %p1765_p4 = scmp.ne.s32.totalorder (!%p1405_p8), %s1758_s21, 0 }
  0x65   : > { %1305 = dma.done.wait (%p1765_p4), %s209_s24, 2048  }
  0x66   : > { %1307 = vsyncadd (%p1765_p4), %s209_s24, 4294965248  ;;  %p1766_p5 = scmp.eq.s32.totalorder %s1386_s19, 0 }
  0x68   : > { %1309 = dma.done.wait (%p1766_p5), [#allocation6], 4096   ;;  %p1767_p8 = pmov %p1766_p5 }
  0x69   : > { %v263_v0 = vld [vmem:[#allocation5] sm:$0xff]  ;;  %v264_v1 = vld [vmem:[#allocation5 + $0x8] sm:$0xff]  ;;  %v265_v2 = vld [vmem:[#allocation5 + $0x10] sm:$0xff]  ;;  %s1681_s11 = scalar_lea.vmem [#allocation8], %s819_s10  ;;  %s830_s12 = sshll.u32 %s1386_s19, 11 }
  0x6a   : > { %1311 = vsyncadd (%p1767_p8), [#allocation6], 4294963200  ;;  %v1007_v3 = vpack.c.bf16 %v264_v1, %v263_v0  ;;  %v266_v4 = vld [vmem:[#allocation5 + $0x18] sm:$0xff]  ;;  %v267_v6 = vld [vmem:[#allocation5 + $0x20] sm:$0xff]  ;;  %s718_s30 = sshll.u32 %s1681_s11, 4  ;;  %s1702_s28 = scalar_lea.hbm %s1754_s4, %s830_s12  ;;  %s1704_s30 = int_to_ptr.vmem [resolvable:$true] %s718_s30 }
  0x6b   : > { %v1011_v5 = vpack.c.bf16 %v266_v4, %v265_v2  ;;  %v268_v7 = vld [vmem:[#allocation5 + $0x28] sm:$0xff]  ;;  %v247_v9 = vld [vmem:[%s1552_s25] sm:$0xff]  ;;  %v269_v10 = vld [vmem:[#allocation5 + $0x30] sm:$0xff]  ;;  %s705_s27 = scalar_lea.sflag [#allocation4], %s1546_s8  ;;  %s1260_s19 = scalar_lea.vmem %s1704_s30, 2048 }
  0x6c   : > { %1008 = vmatprep.subr.bf16.mxu0 %v1007_v3  ;;  %v1015_v8 = vpack.c.bf16 %v268_v7, %v267_v6  ;;  %v270_v11 = vld [vmem:[#allocation5 + $0x38] sm:$0xff]  ;;  %927 = vmatprep.mubr.f32.mxu0 %v247_v9  ;;  %v271_v13 = vld [vmem:[#allocation5 + $0x40] sm:$0xff]  ;;  %v272_v14 = vld [vmem:[#allocation5 + $0x48] sm:$0xff]  ;;  %p1261_p11 = scmp.ne.s32.totalorder %s1704_s30, %s1260_s19  ;;  %p1768_p0 = scmp.ne.s32.totalorder %s1763_s13, 0 }
  0x6d   : > { %1010 = vmatpush3.bf16.msra.mxu0 %v1007_v3  ;;  %v1019_v12 = vpack.c.bf16 %v270_v11, %v269_v10  ;;  %v1023_v15 = vpack.c.bf16 %v272_v14, %v271_v13  ;;  %v273_v16 = vld [vmem:[#allocation5 + $0x50] sm:$0xff]  ;;  %v274_v17 = vld [vmem:[#allocation5 + $0x58] sm:$0xff]  ;;  %v275_v19 = vld [vmem:[#allocation5 + $0x60] sm:$0xff]  ;;  %s1337_s20 = smov [#allocation8]  }
  0x6e   : > { %1012 = vmatprep.subr.bf16.mxu0 %v1011_v5  ;;  %v1027_v18 = vpack.c.bf16 %v274_v17, %v273_v16  ;;  %v276_v20 = vld [vmem:[#allocation5 + $0x68] sm:$0xff]  ;;  %v277_v22 = vld [vmem:[#allocation5 + $0x70] sm:$0xff]  ;;  %v278_v23 = vld [vmem:[#allocation5 + $0x78] sm:$0xff]  ;;  %p1262_p2 = pnand %p1261_p11, %p1768_p0  ;;  %s1264_s29 = sshll.u32 %s1337_s20, 4  ;;  %s1265_s29 = int_to_ptr.vmem [resolvable:$false] %s1264_s29 }
  0x6f   : > { %v1031_v21 = vpack.c.bf16 %v276_v20, %v275_v19  ;;  %v1035_v24 = vpack.c.bf16 %v278_v23, %v277_v22  ;;  %v248_v25 = vld [vmem:[%s1552_s25 + $0x8] sm:$0xff]  ;;  %v249_v26 = vld [vmem:[%s1552_s25 + $0x10] sm:$0xff]  ;;  %v250_v27 = vld [vmem:[%s1552_s25 + $0x18] sm:$0xff]  ;;  %s1266_s5 = scalar_lea.vmem %s1265_s29, 4096  ;;  %p1267_p7 = scmp.lt.s32.totalorder %s1704_s30, %s1265_s29 }
  0x70   : > { %v251_v28 = vld [vmem:[%s1552_s25 + $0x20] sm:$0xff]  ;;  %v252_v29 = vld [vmem:[%s1552_s25 + $0x28] sm:$0xff]  ;;  %v253_v30 = vld [vmem:[%s1552_s25 + $0x30] sm:$0xff]  ;;  %p1263_p3 = pneg %p1262_p2  ;;  %p1268_p9 = scmp.lt.s32.totalorder %s1266_s5, %s1260_s19 }
  0x71   : > { %1014 = vmatpush3.bf16.msra.mxu0 %v1011_v5  ;;  %v254_v31 = vld [vmem:[%s1552_s25 + $0x38] sm:$0xff]  ;;  %v255_v32 = vld [vmem:[%s1552_s25 + $0x40] sm:$0xff]  ;;  %v256_v33 = vld [vmem:[%s1552_s25 + $0x48] sm:$0xff] }
  0x72   : > { %1016 = vmatprep.subr.bf16.mxu0 %v1015_v8  ;;  %v257_v34 = vld [vmem:[%s1552_s25 + $0x50] sm:$0xff]  ;;  %v258_v35 = vld [vmem:[%s1552_s25 + $0x58] sm:$0xff]  ;;  %v259_v36 = vld [vmem:[%s1552_s25 + $0x60] sm:$0xff]  ;;  %p1269_p12 = por %p1268_p9, %p1267_p7 }
  0x73   : > { %v260_v37 = vld [vmem:[%s1552_s25 + $0x68] sm:$0xff]  ;;  %v261_v38 = vld [vmem:[%s1552_s25 + $0x70] sm:$0xff]  ;;  %v262_v39 = vld [vmem:[%s1552_s25 + $0x78] sm:$0xff] }
  0x74   : > { %v527_v40 = vld [vmem:[#allocation7] sm:$0xff]  ;;  %v528_v41 = vld [vmem:[#allocation7 + $0x8] sm:$0xff]  ;;  %v529_v42 = vld [vmem:[#allocation7 + $0x10] sm:$0xff]  ;;  %p1270_p1 = pnand %p1269_p12, %p1263_p3 }
  0x75   : > { %1018 = vmatpush3.bf16.msra.mxu0 %v1015_v8  ;;  %v1039_v43 = vpack.c.bf16 %v528_v41, %v527_v40  ;;  %v530_v44 = vld [vmem:[#allocation7 + $0x18] sm:$0xff]  ;;  %v531_v46 = vld [vmem:[#allocation7 + $0x20] sm:$0xff]  ;;  %v532_v47 = vld [vmem:[#allocation7 + $0x28] sm:$0xff] }
  0x76   : > { %1020 = vmatprep.subr.bf16.mxu0 %v1019_v12  ;;  %v1043_v45 = vpack.c.bf16 %v530_v44, %v529_v42  ;;  %v1047_v48 = vpack.c.bf16 %v532_v47, %v531_v46  ;;  %v533_v49 = vld [vmem:[#allocation7 + $0x30] sm:$0xff]  ;;  %v534_v50 = vld [vmem:[#allocation7 + $0x38] sm:$0xff]  ;;  %v1581_v52 = vld [vmem:[%s1752_s2] ss:$0 sm:$0xff] }
  0x77   : > { %1040 = vmatprep.subr.bf16.mxu1 %v1039_v43  ;;  %v1051_v51 = vpack.c.bf16 %v534_v50, %v533_v49  ;;  %v535_v19 = vld [vmem:[#allocation7 + $0x40] sm:$0xff]  ;;  %v536_v20 = vld [vmem:[#allocation7 + $0x48] sm:$0xff]  ;;  %v542_v46 = vld [vmem:[#allocation7 + $0x78] sm:$0xff] }
  0x78   : > { %1042 = vmatpush3.bf16.msra.mxu1 %v1039_v43  ;;  %v1055_v22 = vpack.c.bf16 %v536_v20, %v535_v19 }
  0x79   : > { %1022 = vmatpush3.bf16.msra.mxu0 %v1019_v12  ;;  %1044 = vmatprep.subr.bf16.mxu1 %v1043_v45 }
  0x7a   : > { %1024 = vmatprep.subr.bf16.mxu0 %v1023_v15 }
  0x7c   : > { %1046 = vmatpush3.bf16.msra.mxu1 %v1043_v45  ;;  %v541_v45 = vld [vmem:[#allocation7 + $0x70] sm:$0xff] }
  0x7d   : > { %1026 = vmatpush3.bf16.msra.mxu0 %v1023_v15  ;;  %1048 = vmatprep.subr.bf16.mxu1 %v1047_v48  ;;  %v1067_v47 = vpack.c.bf16 %v542_v46, %v541_v45 }
  0x7e   : > { %1028 = vmatprep.subr.bf16.mxu0 %v1027_v18 }
  0x80   : > { %1050 = vmatpush3.bf16.msra.mxu1 %v1047_v48 }
  0x81   : > { %1030 = vmatpush3.bf16.msra.mxu0 %v1027_v18  ;;  %1052 = vmatprep.subr.bf16.mxu1 %v1051_v51 }
  0x82   : > { %1032 = vmatprep.subr.bf16.mxu0 %v1031_v21 }
  0x84   : > { %1054 = vmatpush3.bf16.msra.mxu1 %v1051_v51 }
  0x85   : > { %1034 = vmatpush3.bf16.msra.mxu0 %v1031_v21  ;;  %1056 = vmatprep.subr.bf16.mxu1 %v1055_v22 }
  0x86   : > { %1036 = vmatprep.subr.bf16.mxu0 %v1035_v24 }
  0x88   : > { %1058 = vmatpush3.bf16.msra.mxu1 %v1055_v22 }
  0x89   : > { %1038 = vmatpush3.bf16.msra.mxu0 %v1035_v24 }
  0x8c   : > { %928 = vmatmul.mubr.f32.vlgmr.msra.gmra.mrb[0].mxu0 %v248_v25 }
  0x8d   : > { %930 = vmatprep.mubr.f32.mxu0 %v249_v26 }
  0x90   : > { %931 = vmatmul.mubr.f32.gmra.mrb[2].mxu0 %v250_v27 }
  0x91   : > { %933 = vmatprep.mubr.f32.mxu0 %v251_v28 }
  0x94   : > { %934 = vmatmul.mubr.f32.gmra.mrb[4].mxu0 %v252_v29  ;;  %v537_v29 = vld [vmem:[#allocation7 + $0x50] sm:$0xff] }
  0x95   : > { %936 = vmatprep.mubr.f32.mxu0 %v253_v30  ;;  %v538_v30 = vld [vmem:[#allocation7 + $0x58] sm:$0xff] }
  0x98   : > { %937 = vmatmul.mubr.f32.gmra.mrb[6].mxu0 %v254_v31 }
  0x99   : > { %939 = vmatprep.mubr.f32.mxu0 %v255_v32  ;;  %v1059_v32 = vpack.c.bf16 %v538_v30, %v537_v29 }
  0x9b   : > { %1060 = vmatprep.subr.bf16.mxu1 %v1059_v32 }
  0x9c   : > { %940 = vmatmul.mubr.f32.gmra.mrb[8].mxu0 %v256_v33  ;;  %1062 = vmatpush3.bf16.msra.mxu1 %v1059_v32 }
  0x9d   : > { %942 = vmatprep.mubr.f32.mxu0 %v257_v34 }
  0xa0   : > { %943 = vmatmul.mubr.f32.gmra.mrb[10].mxu0 %v258_v35 }
  0xa1   : > { %945 = vmatprep.mubr.f32.mxu0 %v259_v36 }
  0xa4   : > { %946 = vmatmul.mubr.f32.gmra.mrb[12].mxu0 %v260_v37 }
  0xa5   : > { %948 = vmatprep.mubr.f32.mxu0 %v261_v38  ;;  %v539_v38 = vld [vmem:[#allocation7 + $0x60] sm:$0xff] }
  0xa8   : > { %949 = vmatmul.mubr.f32.gmra.mrb[14].mxu0 %v262_v39  ;;  %v540_v39 = vld [vmem:[#allocation7 + $0x68] sm:$0xff] }
  0xa9   : > { %v1063_v41 = vpack.c.bf16 %v540_v39, %v539_v38 }
  0xab   : > { %1064 = vmatprep.subr.bf16.mxu1 %v1063_v41 }
  0xac   : > { %1066 = vmatpush3.bf16.msra.mxu1 %v1063_v41 }
  0xad   : > { %1068 = vmatprep.subr.bf16.mxu1 %v1067_v47 }
  0xb0   : > { %1070 = vmatpush3.bf16.msra.mxu1 %v1067_v47 }
 0x15f   : > { %v929_v53 = vpop.f32.mrb[0].mxu0 }
 0x160   : > { %v352_v54 = vpop.f32.mrb[1].mxu0  ;;  %v1587_v56 = vadd.f32 %v929_v53, %v1581_v52 }
 0x161   : > { %v1584_v55 = vadd.f32 %v1581_v52, %v352_v54 }
 0x162   : > { %v432_v0 = vmul.f32 %v1587_v56, %v1587_v56 }
 0x163   : > { %v932_v57 = vpop.f32.mrb[2].mxu0  ;;  %v431_v58 = vmul.f32 %v1584_v55, %v1584_v55 }
 0x164   : > { %v362_v59 = vpop.f32.mrb[3].mxu0  ;;  %v1595_v61 = vadd.f32 %v932_v57, %v1581_v52 }
 0x165   : > { %v1592_v60 = vadd.f32 %v1581_v52, %v362_v59  ;;  %447 = vadd.xlane.f32.xlu0 %v431_v58 }
 0x166   : > { %v434_v5 = vmul.f32 %v1595_v61, %v1595_v61 }
 0x167   : > { %v935_v62 = vpop.f32.mrb[4].mxu0  ;;  %v433_v63 = vmul.f32 %v1592_v60, %v1592_v60 }
 0x168   : > { %v372_v1 = vpop.f32.mrb[5].mxu0  ;;  %v1605_v3 = vadd.f32 %v935_v62, %v1581_v52 }
 0x169   : > { %v1602_v2 = vadd.f32 %v1581_v52, %v372_v1  ;;  %451 = vadd.xlane.f32.xlu1 %v433_v63  ;;  %449 = vadd.xlane.f32.xlu0 %v432_v0 }
 0x16a   : > { %v436_v11 = vmul.f32 %v1605_v3, %v1605_v3 }
 0x16b   : > { %v938_v4 = vpop.f32.mrb[6].mxu0  ;;  %v435_v6 = vmul.f32 %v1602_v2, %v1602_v2 }
 0x16c   : > { %v382_v7 = vpop.f32.mrb[7].mxu0  ;;  %v1615_v9 = vadd.f32 %v938_v4, %v1581_v52 }
 0x16d   : > { %v1612_v8 = vadd.f32 %v1581_v52, %v382_v7  ;;  %453 = vadd.xlane.f32.xlu1 %v434_v5  ;;  %455 = vadd.xlane.f32.xlu0 %v435_v6 }
 0x16e   : > { %v438_v17 = vmul.f32 %v1615_v9, %v1615_v9 }
 0x16f   : > { %v941_v10 = vpop.f32.mrb[8].mxu0  ;;  %v437_v12 = vmul.f32 %v1612_v8, %v1612_v8 }
 0x170   : > { %v392_v13 = vpop.f32.mrb[9].mxu0  ;;  %v1625_v15 = vadd.f32 %v941_v10, %v1581_v52 }
 0x171   : > { %v1622_v14 = vadd.f32 %v1581_v52, %v392_v13  ;;  %457 = vadd.xlane.f32.xlu1 %v436_v11  ;;  %459 = vadd.xlane.f32.xlu0 %v437_v12 }
 0x172   : > { %v440_v26 = vmul.f32 %v1625_v15, %v1625_v15 }
 0x173   : > { %v944_v16 = vpop.f32.mrb[10].mxu0  ;;  %v439_v18 = vmul.f32 %v1622_v14, %v1622_v14 }
 0x174   : > { %v402_v21 = vpop.f32.mrb[11].mxu0  ;;  %v1635_v24 = vadd.f32 %v944_v16, %v1581_v52 }
 0x175   : > { %v1632_v23 = vadd.f32 %v1581_v52, %v402_v21  ;;  %461 = vadd.xlane.f32.xlu1 %v438_v17  ;;  %463 = vadd.xlane.f32.xlu0 %v439_v18 }
 0x176   : > { %v442_v35 = vmul.f32 %v1635_v24, %v1635_v24 }
 0x177   : > { %v947_v25 = vpop.f32.mrb[12].mxu0  ;;  %v441_v27 = vmul.f32 %v1632_v23, %v1632_v23 }
 0x178   : > { %v412_v28 = vpop.f32.mrb[13].mxu0  ;;  %v1645_v33 = vadd.f32 %v947_v25, %v1581_v52 }
 0x179   : > { %v1642_v31 = vadd.f32 %v1581_v52, %v412_v28  ;;  %465 = vadd.xlane.f32.xlu1 %v440_v26  ;;  %467 = vadd.xlane.f32.xlu0 %v441_v27 }
 0x17a   : > { %v444_v43 = vmul.f32 %v1645_v33, %v1645_v33 }
 0x17b   : > { %v950_v34 = vpop.f32.mrb[14].mxu0  ;;  %v443_v36 = vmul.f32 %v1642_v31, %v1642_v31 }
 0x17c   : > { %v422_v37 = vpop.f32.mrb[15].mxu0  ;;  %v1655_v42 = vadd.f32 %v950_v34, %v1581_v52 }
 0x17d   : > { %v1652_v40 = vadd.f32 %v1581_v52, %v422_v37  ;;  %469 = vadd.xlane.f32.xlu1 %v442_v35  ;;  %471 = vadd.xlane.f32.xlu0 %v443_v36 }
 0x17e   : > { %v446_v48 = vmul.f32 %v1655_v42, %v1655_v42 }
 0x17f   : > { %v445_v44 = vmul.f32 %v1652_v40, %v1652_v40 }
 0x181   : > { %473 = vadd.xlane.f32.xlu1 %v444_v43  ;;  %475 = vadd.xlane.f32.xlu0 %v445_v44 }
 0x185   : > { %477 = vadd.xlane.f32.xlu1 %v446_v48 }
 0x1f2   : > { %v448_v49 = vpop.xlane.xlu0 %447 }
 0x1f3   : > { %v479_v50 = vmax.f32 %v448_v49, 1e-24 }
 0x1f5   : > { %1142 = vrsqrt.f32 %v479_v50 }
 0x1f6   : > { %v452_v51 = vpop.xlane.xlu1 %451  ;;  %v450_v52 = vpop.xlane.xlu0 %449 }
 0x1f7   : > { %v481_v53 = vmax.f32 %v452_v51, 1e-24  ;;  %v480_v54 = vmax.f32 %v450_v52, 1e-24 }
 0x1f9   : > { %1144 = vrsqrt.f32 %v481_v53 }
 0x1fa   : > { %1146 = vrsqrt.f32 %v480_v54  ;;  %v454_v57 = vpop.xlane.xlu1 %453  ;;  %v456_v58 = vpop.xlane.xlu0 %455 }
 0x1fb   : > { %v482_v59 = vmax.f32 %v454_v57, 1e-24  ;;  %v483_v62 = vmax.f32 %v456_v58, 1e-24 }
 0x1fd   : > { %1148 = vrsqrt.f32 %v482_v59 }
 0x1fe   : > { %1150 = vrsqrt.f32 %v483_v62  ;;  %v458_v63 = vpop.xlane.xlu1 %457  ;;  %v460_v0 = vpop.xlane.xlu0 %459 }
 0x1ff   : > { %v1143_v1 = vpop.eup %1142  ;;  %v484_v4 = vmax.f32 %v458_v63, 1e-24  ;;  %v485_v5 = vmax.f32 %v460_v0, 1e-24 }
 0x200   : > { %v511_v6 = vmul.f32 %v1143_v1, %v1584_v55 }
 0x201   : > { %1152 = vrsqrt.f32 %v484_v4 }
 0x202   : > { %1154 = vrsqrt.f32 %v485_v5  ;;  %v462_v7 = vpop.xlane.xlu1 %461  ;;  %983 = vmatprep.mubr.f32.mxu1 %v511_v6  ;;  %v464_v10 = vpop.xlane.xlu0 %463 }
 0x203   : > { %v1145_v11 = vpop.eup %1144  ;;  %v486_v12 = vmax.f32 %v462_v7, 1e-24  ;;  %v487_v13 = vmax.f32 %v464_v10, 1e-24 }
 0x204   : > { %v1147_v16 = vpop.eup %1146  ;;  %v513_v17 = vmul.f32 %v1145_v11, %v1592_v60 }
 0x205   : > { %1156 = vrsqrt.f32 %v486_v12  ;;  %v512_v18 = vmul.f32 %v1147_v16, %v1587_v56 }
 0x206   : > { %1158 = vrsqrt.f32 %v487_v13  ;;  %v466_v19 = vpop.xlane.xlu1 %465  ;;  %v468_v20 = vpop.xlane.xlu0 %467 }
 0x207   : > { %v1149_v21 = vpop.eup %1148  ;;  %v488_v22 = vmax.f32 %v466_v19, 1e-24  ;;  %984 = vmatmul.mubr.f32.vlgmr.msra.gmra.mrb[0].mxu1 %v512_v18  ;;  %v489_v55 = vmax.f32 %v468_v20, 1e-24 }
 0x208   : > { %v1151_v25 = vpop.eup %1150  ;;  %986 = vmatprep.mubr.f32.mxu1 %v513_v17  ;;  %v514_v26 = vmul.f32 %v1149_v21, %v1595_v61 }
 0x209   : > { %1160 = vrsqrt.f32 %v488_v22  ;;  %v515_v27 = vmul.f32 %v1151_v25, %v1602_v2 }
 0x20a   : > { %1162 = vrsqrt.f32 %v489_v55  ;;  %v470_v28 = vpop.xlane.xlu1 %469  ;;  %v472_v60 = vpop.xlane.xlu0 %471 }
 0x20b   : > { %v1153_v29 = vpop.eup %1152  ;;  %v490_v30 = vmax.f32 %v470_v28, 1e-24  ;;  %987 = vmatmul.mubr.f32.gmra.mrb[2].mxu1 %v514_v26  ;;  %v491_v56 = vmax.f32 %v472_v60, 1e-24 }
 0x20c   : > { %v1155_v32 = vpop.eup %1154  ;;  %989 = vmatprep.mubr.f32.mxu1 %v515_v27  ;;  %v516_v34 = vmul.f32 %v1153_v29, %v1605_v3 }
 0x20d   : > { %1164 = vrsqrt.f32 %v490_v30  ;;  %v517_v35 = vmul.f32 %v1155_v32, %v1612_v8 }
 0x20e   : > { %1166 = vrsqrt.f32 %v491_v56  ;;  %v474_v36 = vpop.xlane.xlu1 %473  ;;  %v476_v61 = vpop.xlane.xlu0 %475 }
 0x20f   : > { %v1157_v37 = vpop.eup %1156  ;;  %v492_v38 = vmax.f32 %v474_v36, 1e-24  ;;  %990 = vmatmul.mubr.f32.gmra.mrb[4].mxu1 %v516_v34  ;;  %v493_v2 = vmax.f32 %v476_v61, 1e-24 }
 0x210   : > { %v1159_v39 = vpop.eup %1158  ;;  %992 = vmatprep.mubr.f32.mxu1 %v517_v35  ;;  %v518_v41 = vmul.f32 %v1157_v37, %v1615_v9 }
 0x211   : > { %1168 = vrsqrt.f32 %v492_v38  ;;  %v519_v43 = vmul.f32 %v1159_v39, %v1622_v14 }
 0x212   : > { %1170 = vrsqrt.f32 %v493_v2  ;;  %v478_v44 = vpop.xlane.xlu1 %477 }
 0x213   : > { %v1161_v3 = vpop.eup %1160  ;;  %v494_v45 = vmax.f32 %v478_v44, 1e-24  ;;  %993 = vmatmul.mubr.f32.gmra.mrb[6].mxu1 %v518_v41 }
 0x214   : > { %v1163_v8 = vpop.eup %1162  ;;  %995 = vmatprep.mubr.f32.mxu1 %v519_v43  ;;  %v520_v46 = vmul.f32 %v1161_v3, %v1625_v15 }
 0x215   : > { %1172 = vrsqrt.f32 %v494_v45  ;;  %v521_v47 = vmul.f32 %v1163_v8, %v1632_v23 }
 0x217   : > { %v1165_v48 = vpop.eup %1164  ;;  %996 = vmatmul.mubr.f32.gmra.mrb[8].mxu1 %v520_v46 }
 0x218   : > { %v1167_v49 = vpop.eup %1166  ;;  %998 = vmatprep.mubr.f32.mxu1 %v521_v47  ;;  %v522_v9 = vmul.f32 %v1165_v48, %v1635_v24 }
 0x219   : > { %v523_v14 = vmul.f32 %v1167_v49, %v1642_v31 }
 0x21b   : > { %v1169_v50 = vpop.eup %1168  ;;  %999 = vmatmul.mubr.f32.gmra.mrb[10].mxu1 %v522_v9 }
 0x21c   : > { %v1171_v51 = vpop.eup %1170  ;;  %1001 = vmatprep.mubr.f32.mxu1 %v523_v14  ;;  %v524_v52 = vmul.f32 %v1169_v50, %v1645_v33 }
 0x21d   : > { %v525_v15 = vmul.f32 %v1171_v51, %v1652_v40 }
 0x21f   : > { %v1173_v53 = vpop.eup %1172  ;;  %1002 = vmatmul.mubr.f32.gmra.mrb[12].mxu1 %v524_v52 }
 0x220   : > { %1004 = vmatprep.mubr.f32.mxu1 %v525_v15  ;;  %v526_v23 = vmul.f32 %v1173_v53, %v1655_v42 }
 0x223   : > { %1005 = vmatmul.mubr.f32.gmra.mrb[14].mxu1 %v526_v23 }
 0x2da   : > { %v985_v54 = vpop.f32.mrb[0].mxu1 }
 0x2db   : > { %689 = vst [vmem:[%s1681_s11 + $0x8] sm:$0xff] %v985_v54  ;;  %v609_v24 = vpop.f32.mrb[1].mxu1 }
 0x2dc   : > { %688 = vst [vmem:[%s1681_s11] sm:$0xff] %v609_v24 }
 0x2de   : > { %v988_v31 = vpop.f32.mrb[2].mxu1 }
 0x2df   : > { %691 = vst [vmem:[%s1681_s11 + $0x18] sm:$0xff] %v988_v31  ;;  %v619_v33 = vpop.f32.mrb[3].mxu1 }
 0x2e0   : > { %690 = vst [vmem:[%s1681_s11 + $0x10] sm:$0xff] %v619_v33 }
 0x2e2   : > { %v991_v40 = vpop.f32.mrb[4].mxu1 }
 0x2e3   : > { %693 = vst [vmem:[%s1681_s11 + $0x28] sm:$0xff] %v991_v40  ;;  %v629_v42 = vpop.f32.mrb[5].mxu1 }
 0x2e4   : > { %692 = vst [vmem:[%s1681_s11 + $0x20] sm:$0xff] %v629_v42 }
 0x2e6   : > { %v994_v57 = vpop.f32.mrb[6].mxu1 }
 0x2e7   : > { %695 = vst [vmem:[%s1681_s11 + $0x38] sm:$0xff] %v994_v57  ;;  %v639_v58 = vpop.f32.mrb[7].mxu1 }
 0x2e8   : > { %694 = vst [vmem:[%s1681_s11 + $0x30] sm:$0xff] %v639_v58 }
 0x2ea   : > { %v997_v59 = vpop.f32.mrb[8].mxu1 }
 0x2eb   : > { %697 = vst [vmem:[%s1681_s11 + $0x48] sm:$0xff] %v997_v59  ;;  %v649_v62 = vpop.f32.mrb[9].mxu1 }
 0x2ec   : > { %696 = vst [vmem:[%s1681_s11 + $0x40] sm:$0xff] %v649_v62 }
 0x2ee   : > { %v1000_v63 = vpop.f32.mrb[10].mxu1 }
 0x2ef   : > { %699 = vst [vmem:[%s1681_s11 + $0x58] sm:$0xff] %v1000_v63  ;;  %v659_v0 = vpop.f32.mrb[11].mxu1 }
 0x2f0   : > { %698 = vst [vmem:[%s1681_s11 + $0x50] sm:$0xff] %v659_v0 }
 0x2f2   : > { %v1003_v1 = vpop.f32.mrb[12].mxu1 }
 0x2f3   : > { %701 = vst [vmem:[%s1681_s11 + $0x68] sm:$0xff] %v1003_v1  ;;  %v669_v4 = vpop.f32.mrb[13].mxu1 }
 0x2f4   : > { %700 = vst [vmem:[%s1681_s11 + $0x60] sm:$0xff] %v669_v4 }
 0x2f6   : > { %v1006_v5 = vpop.f32.mrb[14].mxu1 }
 0x2f7   : > { %703 = vst [vmem:[%s1681_s11 + $0x78] sm:$0xff] %v1006_v5  ;;  %v679_v6 = vpop.f32.mrb[15].mxu1 }
 0x2f8   : > { %702 = vst [vmem:[%s1681_s11 + $0x70] sm:$0xff] %v679_v6 }
 0x2f9   : > { %1273 = shalt.err (!%p1270_p1)
}
 0x2fa   : > { %s1274_s9 = scalar_lea.hbm %s1702_s28, 2048  ;;  %s1278_s25 = scalar_lea.hbm %s1754_s4, 4096 }
 0x2fb   : > { %p1275_p13 = scmp.ne.s32.totalorder %s1702_s28, %s1274_s9  ;;  %p1279_p4 = scmp.lt.u32.totalorder %s1702_s28, %s1754_s4 }
 0x2fc   : > { %p1280_p5 = scmp.lt.u32.totalorder %s1278_s25, %s1274_s9  ;;  %p1282_p11 = scmp.lt.u32.totalorder %s1274_s9, %s1702_s28 }
 0x2fd   : > { %p1276_p6 = pnand %p1275_p13, %p1768_p0 }
 0x2fe   : > { %p1281_p8 = por %p1280_p5, %p1279_p4 }
 0x2ff   : > { %p1277_p10 = pneg %p1276_p6 }
 0x300   : > { %p1283_p2 = por %p1282_p11, %p1281_p8 }
 0x302   : > { %p1284_p3 = pnand %p1283_p2, %p1277_p10 }
 0x304   : > { %1287 = shalt.err (!%p1284_p3)
}
 0x305   : > { %s1338_s11 = smov 128   ;;  %s1339_s12 = smov 8  }
 0x306   : > { %1081 = dma.vmem_to_hbm [thread:$0]  (%p1768_p0), %s1704_s30, 2048, %s1702_s28, %s705_s27, %s1338_s11, %s1338_s11, %s1339_s12  }
 0x307 PF: > { %s733_s6 = sand.u32 1, %s1318_s15   ;;  %p1769_p7 = scmp.ne.s32.totalorder %s1759_s22, 0 }
 0x308   : > { %p1770_p9 = scmp.ge.s32.totalorder %s1330_s18, 2  ;;  %s734_s7 = scalar_lea.sflag [#allocation4], %s733_s6 }
 0x30a   : > { %p1095_p12 = pnand %p1770_p9, %p1769_p7 }
 0x30c   : > { %1313 = dma.done.wait (!%p1095_p12), %s734_s7, 2048  }
 0x30d   : > { %1315 = vsyncadd (!%p1095_p12), %s734_s7, 4294965248  ;;  %p18_p1 = scmp.ge.s32.totalorder %s1481_s26, 4   ;;  %s1771_s15 = smov %s1322_s16 }
 0x30e   : > { %s1772_s16 = smov %s1326_s17  ;;  %s1773_s17 = smov %s1497_s14 }
 0x30f   : > { %s1774_s18 = smov %s1481_s26  ;;  %20 = sbr.rel (!%p18_p1) target bundleno = 6 (0x6), region = 89 }
 0x316   :  { %739 = vsyncpa [#allocation3], 1 }
 0x317   :  { %741 = vsyncpa [#allocation3 + $0x1], 1 }
 0x318   :  { %742 = vsyncpa [#allocation6], 1 }
 0x319   :  { %743 = vsyncpa [#allocation4], 1 }
 0x31a   :  { %745 = vsyncpa [#allocation4 + $0x1], 1 }

</bundles_post_ra>
